<compile_context>
chip_gen: v7x
topology: tpu7x:2x2x1
jax: 0.10.0
libtpu: 0.0.40
codegen_flags: <defaults>
</compile_context>

<pallas_src>
import functools
import math

import jax
import jax.numpy as jnp
from jax import lax
from jax.experimental import pallas as pl
from jax.experimental.pallas import tpu as pltpu

_LANE = 128


def _round_up(x, m):
    return (x + m - 1) // m * m


def _hw_config():
    """Generation-aware (tile, vmem_limit_bytes).

    v5e / v6e: 128 MiB VMEM per TensorCore -> 512-wide streamed tiles (halves
    the X / Xe_half re-fetch traffic and the per-step overhead) and a ~100 MiB
    scoped limit.  v7x: 64 MiB/TC -> 256 tiles and 48 MiB (headroom for Mosaic
    internal scratch).  Falls back to the conservative v7x sizing.
    """
    tile, vmem_limit = 256, 48 * 1024 * 1024
    try:
        info = pltpu.get_tpu_info()
        vmem = getattr(info, "vmem_capacity_bytes", None)
        if vmem is not None and vmem >= 100 * 1024 * 1024:
            tile, vmem_limit = 512, 100 * 1024 * 1024
    except Exception:
        pass
    return tile, vmem_limit


# ---------------------------------------------------------------------------
# Phase 1:  Xe_half = C @ X         ([Ep, Np] @ [Np, Fp] -> [Ep, Fp])
#   grid = (edge tiles [parallel], vertex tiles [arbitrary reduction])
# ---------------------------------------------------------------------------
def _edge_gather_kernel(nz_ref, c_ref, x_ref, xe_ref, acc_ref):
    i = pl.program_id(0)
    k = pl.program_id(1)

    @pl.when(k == 0)
    def _():
        acc_ref[...] = jnp.zeros_like(acc_ref)

    @pl.when(nz_ref[i, k] != 0)           # skip MXU work on all-zero C tiles
    def _():
        acc_ref[...] += jnp.dot(c_ref[...], x_ref[...],
                                preferred_element_type=jnp.float32)

    @pl.when(k == pl.num_programs(1) - 1)
    def _():
        xe_ref[...] = acc_ref[...].astype(xe_ref.dtype)


# ---------------------------------------------------------------------------
# Phase 2: per node-row tile (grid = (node tiles [parallel],
#                                     edge tiles [arbitrary reduction])):
#   Xv  = Ct @ Xe_half                      (degV already folded into Ct rows)
#   Xv  = row-l2-normalize(Xv)              (optional, rsqrt on EUP)
#   Xi  = (1 - alpha) * Xv + alpha * X0
#   out = (1 - beta) * Xi + beta * (Xi @ Wt)
# alpha / beta / use_norm are compile-time constants (functools.partial).
# ---------------------------------------------------------------------------
def _node_update_kernel(alpha, beta, use_norm,
                        nz_ref, ct_ref, xe_ref, x0_ref, wt_ref,
                        out_ref, acc_ref):
    n = pl.program_id(0)
    e = pl.program_id(1)

    @pl.when(e == 0)
    def _():
        acc_ref[...] = jnp.zeros_like(acc_ref)

    @pl.when(nz_ref[e, n] != 0)           # same nonzero map, transposed lookup
    def _():
        # Plain jnp.dot on a precomputed Ct tile: no per-step tile transpose.
        acc_ref[...] += jnp.dot(ct_ref[...], xe_ref[...],
                                preferred_element_type=jnp.float32)

    @pl.when(e == pl.num_programs(1) - 1)
    def _():
        xv = acc_ref[...]                                     # degV folded in
        if use_norm:
            sq = jnp.sum(xv * xv, axis=1, keepdims=True)
            scale = jnp.where(sq > 0.0, lax.rsqrt(sq), 0.0)   # EUP rsqrt; inf->0
            xv = xv * scale
        xi = (1.0 - alpha) * xv + alpha * x0_ref[...]         # f32 residual blend
        wxi = jnp.dot(xi.astype(wt_ref.dtype), wt_ref[...],
                      preferred_element_type=jnp.float32)
        out_ref[...] = ((1.0 - beta) * xi + beta * wxi).astype(out_ref.dtype)


# ---------------------------------------------------------------------------
# One-time (per static hypergraph) preprocessing — hoisted out of the
# per-layer forward path so the dense scatter build, the scaling folds, the
# transpose and the tile-sparsity map are amortized across every layer / step.
# ---------------------------------------------------------------------------
def build_graph_operators(vertex, edges, degE, degV, *, num_vertices, num_edges,
                          tile, mxu_dtype=jnp.bfloat16):
    """Returns (C, Ct, nzmap), zero-padded to `tile` multiples.

      C  [Ep, Np] = diag(sqrt(degE/|e|)) @ A
      Ct [Np, Ep] = diag(degV) @ C^T
      nzmap [Ep/tile, Np/tile] int32 : 1 where the C tile has any nonzero.

    C @ X reproduces scatter-mean(X[vertex], edges) * degE up to the symmetric
    sqrt split, and Ct @ (C @ X) is exactly the UniGCNIIConv message chain.
    Requires degE >= 0 (true for UniGNN's degree-based scalings).
    """
    N, E = num_vertices, num_edges
    Ep = _round_up(max(E, 1), tile)
    Np = _round_up(max(N, 1), tile)

    A = jnp.zeros((E, N), jnp.float32).at[edges, vertex].add(1.0)
    cnt = jnp.sum(A, axis=1, keepdims=True)                       # |e| per edge
    s = jnp.where(cnt > 0.0, degE.reshape(E, 1) / cnt, 0.0)       # degE / |e|
    C = A * jnp.sqrt(s)
    Cp = jnp.pad(C, ((0, Ep - E), (0, Np - N)))

    degVp = jnp.pad(degV.reshape(N, 1).astype(jnp.float32), ((0, Np - N), (0, 0)))
    Ctp = Cp.T * degVp                                            # fold degV in

    nzmap = jnp.any(
        Cp.reshape(Ep // tile, tile, Np // tile, tile) != 0.0,
        axis=(1, 3)).astype(jnp.int32)

    return Cp.astype(mxu_dtype), Ctp.astype(mxu_dtype), nzmap


def pad_node_features(X, Np, Fp, dtype):
    N, F = X.shape
    return jnp.pad(X.astype(jnp.float32), ((0, Np - N), (0, Fp - F))).astype(dtype)


def pad_weight(Wt, Fp, dtype):
    fi, fo = Wt.shape
    return jnp.pad(Wt.astype(jnp.float32), ((0, Fp - fi), (0, Fp - fo))).astype(dtype)


# ---------------------------------------------------------------------------
# UniGCNIIConv forward (operates entirely in padded layout; pad once per
# layer stack outside and slice [:N, :F] once at the very end).
# ---------------------------------------------------------------------------
def unigcnii_conv(C, Ct, nzmap, Xp, X0p, Wtp, alpha, beta, *,
                  use_norm=True, out_dtype=jnp.float32,
                  inter_dtype=jnp.bfloat16, vmem_limit_bytes=48 * 1024 * 1024):
    Ep, Np = C.shape
    Fp = Xp.shape[1]
    nEt, nNt = nzmap.shape
    tE = Ep // nEt
    tN = Np // nNt
    itemsize = jnp.dtype(C.dtype).itemsize

    # Pipeline depth 3 on the streamed operands hides DMA issue latency when
    # per-step compute is short; clamp for tiny grids.
    depth1 = max(2, min(3, nEt * nNt))
    depth2 = max(2, min(3, nNt * nEt))

    cparams = pltpu.CompilerParams(
        dimension_semantics=("parallel", "arbitrary"),
        vmem_limit_bytes=vmem_limit_bytes,
    )

    # ---- Phase 1: Xe_half = C @ X  (reduction over vertex tiles) ------------
    xe_half = pl.pallas_call(
        _edge_gather_kernel,
        out_shape=jax.ShapeDtypeStruct((Ep, Fp), inter_dtype),
        grid_spec=pltpu.PrefetchScalarGridSpec(
            num_scalar_prefetch=1,
            grid=(nEt, nNt),
            in_specs=[
                pl.BlockSpec((tE, tN), lambda i, k, nz: (i, k),
                             pipeline_mode=pl.Buffered(depth1)),   # C tile
                pl.BlockSpec((tN, Fp), lambda i, k, nz: (k, 0),
                             pipeline_mode=pl.Buffered(depth1)),   # X tile
            ],
            out_specs=pl.BlockSpec((tE, Fp), lambda i, k, nz: (i, 0)),
            scratch_shapes=[pltpu.VMEM((tE, Fp), jnp.float32)],
        ),
        compiler_params=cparams,
        cost_estimate=pl.CostEstimate(
            flops=2 * Ep * Np * Fp,
            transcendentals=0,
            bytes_accessed=(Ep * Np + (Ep // tE) * Np * Fp + Ep * Fp) * itemsize,
        ),
    )(nzmap, C, Xp)

    # ---- Phase 2: node update (reduction over edge tiles) -------------------
    kernel2 = functools.partial(_node_update_kernel,
                                float(alpha), float(beta), bool(use_norm))
    out = pl.pallas_call(
        kernel2,
        out_shape=jax.ShapeDtypeStruct((Np, Fp), out_dtype),
        grid_spec=pltpu.PrefetchScalarGridSpec(
            num_scalar_prefetch=1,
            grid=(nNt, nEt),
            in_specs=[
                pl.BlockSpec((tN, tE), lambda n, e, nz: (n, e),
                             pipeline_mode=pl.Buffered(depth2)),   # Ct tile
                pl.BlockSpec((tE, Fp), lambda n, e, nz: (e, 0)),   # Xe_half tile
                pl.BlockSpec((tN, Fp), lambda n, e, nz: (n, 0)),   # X0 tile
                pl.BlockSpec((Fp, Fp), lambda n, e, nz: (0, 0)),   # Wt (resident)
            ],
            out_specs=pl.BlockSpec((tN, Fp), lambda n, e, nz: (n, 0)),
            scratch_shapes=[pltpu.VMEM((tN, Fp), jnp.float32)],
        ),
        compiler_params=cparams,
        cost_estimate=pl.CostEstimate(
            flops=2 * Np * Ep * Fp + 2 * Np * Fp * Fp,
            transcendentals=Np if use_norm else 0,
            bytes_accessed=(Np * Ep + (Np // tN) * Ep * Fp + Fp * Fp) * itemsize
                           + Np * Fp * (4 + jnp.dtype(out_dtype).itemsize),
        ),
    )(nzmap, Ct, xe_half, X0p, Wtp)

    return out


# ---------------------------------------------------------------------------
# Plain-JAX reference mirroring the PyTorch module (for correctness check).
# ---------------------------------------------------------------------------
def _reference_forward(X, vertex, edges, degE, degV, X0, Wt, alpha, beta,
                       num_edges, use_norm=True):
    N, F = X.shape
    E = num_edges
    Xve = X[vertex]
    sums = jnp.zeros((E, F), jnp.float32).at[edges].add(Xve)
    cnts = jnp.zeros((E,), jnp.float32).at[edges].add(1.0)
    Xe = sums / jnp.maximum(cnts, 1.0)[:, None]
    Xe = Xe * degE
    Xev = Xe[edges]
    Xv = jnp.zeros((N, F), jnp.float32).at[vertex].add(Xev)
    Xv = Xv * degV
    if use_norm:
        norm = jnp.sqrt(jnp.sum(Xv * Xv, axis=1, keepdims=True))
        scale = jnp.where(norm == 0.0, 0.0, 1.0 / norm)
        Xv = Xv * scale
    Xi = (1.0 - alpha) * Xv + alpha * X0
    return (1.0 - beta) * Xi + beta * (Xi @ Wt)


if __name__ == "__main__":
    # Small deterministic hypergraph: N nodes, E hyperedges, 3 vertices/edge.
    N, E, F = 16, 8, 32           # in_features == out_features (GCNII residual)
    verts_per_edge = 3
    lamda, alpha = 0.5, 0.1
    beta = math.log(lamda / 1.0 + 1.0)      # layer i=0, as in UniGCNII.forward

    key = jax.random.PRNGKey(0)
    k_x, k_x0, k_w, k_v, k_de, k_dv = jax.random.split(key, 6)

    X = jax.random.normal(k_x, (N, F), jnp.float32)
    X0 = jax.random.normal(k_x0, (N, F), jnp.float32)

    # nn.Linear(F, F, bias=False): W is [out, in]; the kernel consumes Wt = W.T.
    bound = 1.0 / (F ** 0.5)
    W = jax.random.uniform(k_w, (F, F), jnp.float32, minval=-bound, maxval=bound)
    Wt = W.T

    vertex = jax.random.randint(k_v, (E * verts_per_edge,), 0, N, dtype=jnp.int32)
    edges = jnp.repeat(jnp.arange(E, dtype=jnp.int32), verts_per_edge)

    # args.UniGNN_degE : [E, 1], args.UniGNN_degV : [N, 1] (positive scalings).
    degE = jax.random.uniform(k_de, (E, 1), jnp.float32, minval=0.5, maxval=1.5)
    degV = jax.random.uniform(k_dv, (N, 1), jnp.float32, minval=0.5, maxval=1.5)

    ref = _reference_forward(X, vertex, edges, degE, degV, X0, Wt, alpha, beta,
                             num_edges=E, use_norm=True)

    tile, vmem_limit = _hw_config()
    Fp = _round_up(F, _LANE)
    Np = _round_up(max(N, 1), tile)

    # Run the bf16-MXU production path and the f32 path; tolerance covers the
    # bf16-input / f32-accumulate rounding of the matmuls.
    for mxu_dtype in (jnp.bfloat16, jnp.float32):
        C, Ct, nzmap = build_graph_operators(
            vertex, edges, degE, degV, num_vertices=N, num_edges=E,
            tile=tile, mxu_dtype=mxu_dtype)
        # Pad once per layer stack (not per layer); slice once at the end.
        Xp = pad_node_features(X, Np, Fp, mxu_dtype)
        X0p = pad_node_features(X0, Np, Fp, jnp.float32)
        Wtp = pad_weight(Wt, Fp, mxu_dtype)

        out_p = unigcnii_conv(C, Ct, nzmap, Xp, X0p, Wtp, alpha, beta,
                              use_norm=True, out_dtype=jnp.float32,
                              inter_dtype=mxu_dtype,
                              vmem_limit_bytes=vmem_limit)
        out_p = jax.block_until_ready(out_p)
        out = out_p[:N, :F]
        assert out.shape == (N, F)
        assert jnp.allclose(out, ref, rtol=5e-2, atol=5e-2), \
            f"mismatch vs reference ({mxu_dtype})"

    print("KERNEL_OK")
</pallas_src>

<mosaic_0001>
module attributes {stable_mosaic.version = 11 : i64} {
  func.func @_edge_gather_kernel(%arg0: i32, %arg1: i32, %arg2: memref<1x1xi32, #tpu.memory_space<smem>>, %arg3: memref<256x256xbf16, #tpu.memory_space<vmem>>, %arg4: memref<256x128xbf16, #tpu.memory_space<vmem>>, %arg5: memref<256x128xbf16, #tpu.memory_space<vmem>>, %arg6: memref<256x128xf32, #tpu.memory_space<vmem>>) attributes {dimension_semantics = [#tpu.dimension_semantics<parallel>, #tpu.dimension_semantics<arbitrary>], iteration_bounds = array<i64: 1, 1>, scalar_prefetch = 1 : i64, scratch_operands = 1 : i64, tpu.core_type = #tpu.core_type<tc>, window_params = [{pipeline_mode = #tpu.pipeline_mode<double_buffered>, transform_indices = @transform_0, window_bounds = array<i64: 256, 256>}, {pipeline_mode = #tpu.pipeline_mode<double_buffered>, transform_indices = @transform_1, window_bounds = array<i64: 256, 128>}, {transform_indices = @transform_2, window_bounds = array<i64: 256, 128>}]} {
    %c0_i32 = arith.constant 0 : i32
    %0 = arith.cmpi eq, %arg1, %c0_i32 : i32
    %1 = arith.extui %0 : i1 to i32
    %c0_i32_0 = arith.constant 0 : i32
    %2 = arith.cmpi ne, %1, %c0_i32_0 : i32
    scf.if %2 {
      %cst = arith.constant 0.000000e+00 : f32
      %12 = vector.broadcast %cst : f32 to vector<256x128xf32>
      %c0 = arith.constant 0 : index
      %c0_5 = arith.constant 0 : index
      %13 = vector.load %arg6[%c0, %c0_5] : memref<256x128xf32, #tpu.memory_space<vmem>>, vector<256x128xf32>
      tpu.vector_store %arg6[%c0, %c0_5], %12 {strides = array<i32>} : memref<256x128xf32, #tpu.memory_space<vmem>>, vector<256x128xf32>,
    } else {
    }
    %3 = arith.index_cast %arg0 : i32 to index
    %4 = arith.index_cast %arg1 : i32 to index
    %5 = memref.load %arg2[%3, %4] : memref<1x1xi32, #tpu.memory_space<smem>>
    %c0_i32_1 = arith.constant 0 : i32
    %6 = arith.cmpi ne, %5, %c0_i32_1 : i32
    %7 = arith.extui %6 : i1 to i32
    %c0_i32_2 = arith.constant 0 : i32
    %8 = arith.cmpi ne, %7, %c0_i32_2 : i32
    scf.if %8 {
      %c0 = arith.constant 0 : index
      %c0_5 = arith.constant 0 : index
      %12 = vector.load %arg6[%c0, %c0_5] : memref<256x128xf32, #tpu.memory_space<vmem>>, vector<256x128xf32>
      %c0_6 = arith.constant 0 : index
      %c0_7 = arith.constant 0 : index
      %13 = vector.load %arg3[%c0_6, %c0_7] : memref<256x256xbf16, #tpu.memory_space<vmem>>, vector<256x256xbf16>
      %c0_8 = arith.constant 0 : index
      %c0_9 = arith.constant 0 : index
      %14 = vector.load %arg4[%c0_8, %c0_9] : memref<256x128xbf16, #tpu.memory_space<vmem>>, vector<256x128xbf16>
      %cst = arith.constant dense<0.000000e+00> : vector<256x128xf32>
      %15 = tpu.matmul %13, %14, %cst {dimension_numbers = #tpu.dot_dimension_numbers<[1], [0], [0], [1], [0, 0, 1, 1], [], []>} : vector<256x256xbf16>, vector<256x128xbf16>, vector<256x128xf32> -> vector<256x128xf32>
      %16 = arith.addf %12, %15 : vector<256x128xf32>
      %c0_10 = arith.constant 0 : index
      %c0_11 = arith.constant 0 : index
      %17 = vector.load %arg6[%c0_10, %c0_11] : memref<256x128xf32, #tpu.memory_space<vmem>>, vector<256x128xf32>
      tpu.vector_store %arg6[%c0_10, %c0_11], %16 {strides = array<i32>} : memref<256x128xf32, #tpu.memory_space<vmem>>, vector<256x128xf32>,
    } else {
    }
    %c0_i32_3 = arith.constant 0 : i32
    %9 = arith.cmpi eq, %arg1, %c0_i32_3 : i32
    %10 = arith.extui %9 : i1 to i32
    %c0_i32_4 = arith.constant 0 : i32
    %11 = arith.cmpi ne, %10, %c0_i32_4 : i32
    scf.if %11 {
      %c0 = arith.constant 0 : index
      %c0_5 = arith.constant 0 : index
      %12 = vector.load %arg6[%c0, %c0_5] : memref<256x128xf32, #tpu.memory_space<vmem>>, vector<256x128xf32>
      %13 = arith.truncf %12 : vector<256x128xf32> to vector<256x128xbf16>
      %c0_6 = arith.constant 0 : index
      %c0_7 = arith.constant 0 : index
      %14 = vector.load %arg5[%c0_6, %c0_7] : memref<256x128xbf16, #tpu.memory_space<vmem>>, vector<256x128xbf16>
      tpu.vector_store %arg5[%c0_6, %c0_7], %13 {strides = array<i32>} : memref<256x128xbf16, #tpu.memory_space<vmem>>, vector<256x128xbf16>,
    } else {
    }
    return
  }
  func.func @transform_0(%arg0: i32, %arg1: i32, %arg2: memref<1x1xi32, #tpu.memory_space<smem>>) -> (i32, i32) {
    %c0_i32 = arith.constant 0 : i32
    return %arg0, %arg1 : i32, i32
  }
  func.func @transform_1(%arg0: i32, %arg1: i32, %arg2: memref<1x1xi32, #tpu.memory_space<smem>>) -> (i32, i32) {
    %c0_i32 = arith.constant 0 : i32
    %c0_i32_0 = arith.constant 0 : i32
    return %arg1, %c0_i32 : i32, i32
  }
  func.func @transform_2(%arg0: i32, %arg1: i32, %arg2: memref<1x1xi32, #tpu.memory_space<smem>>) -> (i32, i32) {
    %c0_i32 = arith.constant 0 : i32
    %c0_i32_0 = arith.constant 0 : i32
    return %arg0, %c0_i32 : i32, i32
  }
}

</mosaic_0001>

<bundles_post_ra>
// kernel: tpu_custom_call.1
= control target key start
LH: loop header
LB: loop body
LE: loop exit
PB: predicated region body
PF: predicated region fallthrough
CT: control target
= control target key end

     0   :  { %9 = vsyncpa [#allocation6], 0  ;;  %s1430_s0 = inlined_call_operand.<no memory space> [shape: s32[1,1], index: 0, kind: input, shape index: {}]   ;;  %s1431_s1 = inlined_call_operand.hbm [shape: bf16[256,256], index: 1, kind: input, shape index: {}]   ;;  %s1432_s2 = inlined_call_operand.hbm [shape: bf16[256,128], index: 2, kind: input, shape index: {}]   ;;  %s1433_s3 = inlined_call_operand.hbm [shape: bf16[256,128], index: 3, kind: output, shape index: {}]  }
   0x1   :  { %10 = vsyncpa [#allocation9], 0 }
   0x2   :  { %11 = vsyncpa [#allocation7], 0  ;;  %s1357_s12 = smov [#allocation5]   ;;  %s1285_s16 = scalar_lea.hbm %s1431_s1, 4096 }
   0x3   :  { %s17_s13 = sshll.u32 %s1357_s12, 4  ;;  %p1286_p0 = scmp.ne.s32.totalorder %s1431_s1, %s1285_s16  ;;  %s18_s13 = int_to_ptr.vmem [resolvable:$true] %s17_s13 }
   0x4   :  { %p1289_p1 = scmp.lt.u32.totalorder %s1285_s16, %s1431_s1 }
   0x6   :  { %p1291_p2 = pnand %p1289_p1, %p1286_p0 }
   0x8   :  { %1294 = shalt.err (!%p1291_p2)
}
   0x9   :  { %s1295_s21 = scalar_lea.vmem %s18_s13, 4096  ;;  %p1300_p4 = scmp.lt.s32.totalorder %s18_s13, %s18_s13 }
   0xa   :  { %p1296_p3 = scmp.ne.s32.totalorder %s18_s13, %s1295_s21  ;;  %p1301_p5 = scmp.lt.s32.totalorder %s1295_s21, %s1295_s21 }
   0xc   :  { %p1302_p6 = por %p1301_p5, %p1300_p4 }
   0xe   :  { %p1303_p7 = pnand %p1302_p6, %p1296_p3 }
  0x10   :  { %1306 = shalt.err (!%p1303_p7)
}
  0x11   :  { %s1358_s22 = smov 128   ;;  %s1359_s23 = smov 8  }
  0x12   :  { %23 = dma.hbm_to_vmem [thread:$0]  %s1431_s1, 4096, %s18_s13, [#allocation6], %s1358_s22, %s1358_s22, %s1359_s23  }
  0x13   :  { %s1360_s26 = smov [#allocation8]   ;;  %s1307_s30 = scalar_lea.hbm %s1432_s2, 2048 }
  0x14   :  { %s29_s27 = sshll.u32 %s1360_s26, 4  ;;  %p1308_p8 = scmp.ne.s32.totalorder %s1432_s2, %s1307_s30  ;;  %s30_s27 = int_to_ptr.vmem [resolvable:$true] %s29_s27 }
  0x15   :  { %p1311_p9 = scmp.lt.u32.totalorder %s1307_s30, %s1432_s2 }
  0x17   :  { %p1313_p10 = pnand %p1311_p9, %p1308_p8 }
  0x19   :  { %1316 = shalt.err (!%p1313_p10)
}
  0x1a   :  { %s1317_s8 = scalar_lea.vmem %s30_s27, 2048  ;;  %p1322_p12 = scmp.lt.s32.totalorder %s30_s27, %s30_s27 }
  0x1b   :  { %p1318_p11 = scmp.ne.s32.totalorder %s30_s27, %s1317_s8  ;;  %p1323_p13 = scmp.lt.s32.totalorder %s1317_s8, %s1317_s8 }
  0x1d   :  { %p1324_p0 = por %p1323_p13, %p1322_p12 }
  0x1f   :  { %p1325_p1 = pnand %p1324_p0, %p1318_p11 }
  0x21   :  { %1328 = shalt.err (!%p1325_p1)
}
  0x22   :  { %s1361_s1 = smov 64   ;;  %s1362_s9 = smov 4  }
  0x23   :  { %35 = dma.hbm_to_vmem [thread:$0]  %s1432_s2, 2048, %s30_s27, [#allocation9], %s1361_s1, %s1361_s1, %s1362_s9  }
  0x24   :  { %1351 = dma.done.wait [#allocation6], 4096  }
  0x25   :  { %1352 = vsyncadd [#allocation6], 4294963200 }
  0x26   :  { %1353 = dma.done.wait [#allocation9], 2048  }
  0x27   :  { %1354 = vsyncadd [#allocation9], 4294965248  ;;  %v1363_v0 = vmov 0.0   ;;  %p877_p2 = scmp.eq.s32.totalorder %s1430_s0, 0 }
  0x28   :  { %47 = vst [vmem:[#allocation2] sm:$0xff] %v1363_v0  ;;  %48 = vst [vmem:[#allocation2 + $0x8] sm:$0xff] %v1363_v0  ;;  %v1221_v1 = vld [vmem:[#allocation8 + $0x40] sm:$0xff] (!%p877_p2)   ;;  %v1223_v3 = vld [vmem:[#allocation8 + $0x48] sm:$0xff] (!%p877_p2)  }
  0x29   :  { %49 = vst [vmem:[#allocation2 + $0x10] sm:$0xff] %v1363_v0  ;;  %50 = vst [vmem:[#allocation2 + $0x18] sm:$0xff] %v1363_v0  ;;  %v1222_v2 = vld [vmem:[#allocation8] sm:$0xff] (!%p877_p2)   ;;  %1085 = vmatprep.subr.bf16.mxu0 (!%p877_p2), %v1221_v1  ;;  %1197 = vmatprep.subr.bf16.mxu1 (!%p877_p2), %v1221_v1  ;;  %v1224_v4 = vld [vmem:[#allocation8 + $0x8] sm:$0xff] (!%p877_p2)  }
  0x2a   :  { %51 = vst [vmem:[#allocation2 + $0x20] sm:$0xff] %v1363_v0  ;;  %52 = vst [vmem:[#allocation2 + $0x28] sm:$0xff] %v1363_v0  ;;  %1086 = vmatpush3.bf16.msra.mxu0 (!%p877_p2), %v1222_v2  ;;  %1205 = vmatpush3.bf16.msra.mxu1 (!%p877_p2), %v1222_v2  ;;  %v1225_v5 = vld [vmem:[#allocation8 + $0x50] sm:$0xff] (!%p877_p2)   ;;  %v1227_v7 = vld [vmem:[#allocation8 + $0x58] sm:$0xff] (!%p877_p2)  }
  0x2b   :  { %53 = vst [vmem:[#allocation2 + $0x30] sm:$0xff] %v1363_v0  ;;  %54 = vst [vmem:[#allocation2 + $0x38] sm:$0xff] %v1363_v0  ;;  %1087 = vmatprep.subr.bf16.mxu0 (!%p877_p2), %v1223_v3  ;;  %1198 = vmatprep.subr.bf16.mxu1 (!%p877_p2), %v1223_v3  ;;  %v1226_v6 = vld [vmem:[#allocation8 + $0x10] sm:$0xff] (!%p877_p2)   ;;  %v1228_v8 = vld [vmem:[#allocation8 + $0x18] sm:$0xff] (!%p877_p2)  }
  0x2c   :  { %55 = vst [vmem:[#allocation2 + $0x40] sm:$0xff] %v1363_v0  ;;  %56 = vst [vmem:[#allocation2 + $0x48] sm:$0xff] %v1363_v0  ;;  %v1229_v9 = vld [vmem:[#allocation8 + $0x60] sm:$0xff] (!%p877_p2)   ;;  %v1231_v11 = vld [vmem:[#allocation8 + $0x68] sm:$0xff] (!%p877_p2)  }
  0x2d   :  { %57 = vst [vmem:[#allocation2 + $0x50] sm:$0xff] %v1363_v0  ;;  %58 = vst [vmem:[#allocation2 + $0x58] sm:$0xff] %v1363_v0  ;;  %v1230_v10 = vld [vmem:[#allocation8 + $0x20] sm:$0xff] (!%p877_p2)   ;;  %v1232_v14 = vld [vmem:[#allocation8 + $0x28] sm:$0xff] (!%p877_p2)  }
  0x2e   :  { %59 = vst [vmem:[#allocation2 + $0x60] sm:$0xff] %v1363_v0  ;;  %60 = vst [vmem:[#allocation2 + $0x68] sm:$0xff] %v1363_v0  ;;  %1088 = vmatpush3.bf16.msra.mxu0 (!%p877_p2), %v1224_v4  ;;  %1206 = vmatpush3.bf16.msra.mxu1 (!%p877_p2), %v1224_v4  ;;  %v1239_v12 = vld [vmem:[#allocation5 + $0x4] ss:$8 sps:$4 sm:$0xff] (!%p877_p2)   ;;  %v1233_v15 = vld [vmem:[#allocation8 + $0x70] sm:$0xff] (!%p877_p2)  }
  0x2f   :  { %61 = vst [vmem:[#allocation2 + $0x70] sm:$0xff] %v1363_v0  ;;  %62 = vst [vmem:[#allocation2 + $0x78] sm:$0xff] %v1363_v0  ;;  %1089 = vmatprep.subr.bf16.mxu0 (!%p877_p2), %v1225_v5  ;;  %1199 = vmatprep.subr.bf16.mxu1 (!%p877_p2), %v1225_v5  ;;  %v1242_v13 = vld [vmem:[#allocation5 + $0x84] ss:$8 sps:$4 sm:$0xff] (!%p877_p2)   ;;  %v1234_v16 = vld [vmem:[#allocation8 + $0x30] sm:$0xff] (!%p877_p2)  }
  0x30   :  { %63 = vst [vmem:[#allocation2 + $0x80] sm:$0xff] %v1363_v0  ;;  %64 = vst [vmem:[#allocation2 + $0x88] sm:$0xff] %v1363_v0  ;;  %471 = vmatprep.mubr.bf16.mxu0 (!%p877_p2), %v1239_v12  ;;  %535 = vmatprep.mubr.bf16.mxu1 (!%p877_p2), %v1242_v13  ;;  %v1235_v17 = vld [vmem:[#allocation8 + $0x78] sm:$0xff] (!%p877_p2)   ;;  %v1237_v19 = vld [vmem:[#allocation5] ss:$8 sps:$4 sm:$0xff] (!%p877_p2)  }
  0x31   :  { %65 = vst [vmem:[#allocation2 + $0x90] sm:$0xff] %v1363_v0  ;;  %66 = vst [vmem:[#allocation2 + $0x98] sm:$0xff] %v1363_v0  ;;  %86 = sbr.rel (%p877_p2) target bundleno = 349 (0x15d), region = 25  ;;  %v1236_v18 = vld [vmem:[#allocation8 + $0x38] sm:$0xff] (!%p877_p2)   ;;  %v1240_v20 = vld [vmem:[#allocation5 + $0x80] ss:$8 sps:$4 sm:$0xff] (!%p877_p2)  }
  0x32   :  { %67 = vst [vmem:[#allocation2 + $0xa0] sm:$0xff] %v1363_v0  ;;  %68 = vst [vmem:[#allocation2 + $0xa8] sm:$0xff] %v1363_v0  ;;  %1090 = vmatpush3.bf16.msra.mxu0 (!%p877_p2), %v1226_v6  ;;  %1207 = vmatpush3.bf16.msra.mxu1 (!%p877_p2), %v1226_v6  ;;  %v1243_v21 = vld [vmem:[#allocation5 + $0x14] ss:$8 sps:$4 sm:$0xff] (!%p877_p2)   ;;  %v1247_v23 = vld [vmem:[#allocation5 + $0x10] ss:$8 sps:$4 sm:$0xff] (!%p877_p2)  }
  0x33   :  { %69 = vst [vmem:[#allocation2 + $0xb0] sm:$0xff] %v1363_v0  ;;  %70 = vst [vmem:[#allocation2 + $0xb8] sm:$0xff] %v1363_v0  ;;  %1091 = vmatprep.subr.bf16.mxu0 (!%p877_p2), %v1227_v7  ;;  %1200 = vmatprep.subr.bf16.mxu1 (!%p877_p2), %v1227_v7  ;;  %v1245_v22 = vld [vmem:[#allocation5 + $0x94] ss:$8 sps:$4 sm:$0xff] (!%p877_p2)   ;;  %v1248_v24 = vld [vmem:[#allocation5 + $0x90] ss:$8 sps:$4 sm:$0xff] (!%p877_p2)  }
  0x34   :  { %71 = vst [vmem:[#allocation2 + $0xc0] sm:$0xff] %v1363_v0  ;;  %72 = vst [vmem:[#allocation2 + $0xc8] sm:$0xff] %v1363_v0  ;;  %v1249_v25 = vld [vmem:[#allocation5 + $0x24] ss:$8 sps:$4 sm:$0xff] (!%p877_p2)   ;;  %v1253_v27 = vld [vmem:[#allocation5 + $0x20] ss:$8 sps:$4 sm:$0xff] (!%p877_p2)  }
  0x35   :  { %73 = vst [vmem:[#allocation2 + $0xd0] sm:$0xff] %v1363_v0  ;;  %74 = vst [vmem:[#allocation2 + $0xd8] sm:$0xff] %v1363_v0  ;;  %v1251_v26 = vld [vmem:[#allocation5 + $0xa4] ss:$8 sps:$4 sm:$0xff] (!%p877_p2)   ;;  %v1254_v28 = vld [vmem:[#allocation5 + $0xa0] ss:$8 sps:$4 sm:$0xff] (!%p877_p2)  }
  0x36   :  { %75 = vst [vmem:[#allocation2 + $0xe0] sm:$0xff] %v1363_v0  ;;  %76 = vst [vmem:[#allocation2 + $0xe8] sm:$0xff] %v1363_v0  ;;  %1092 = vmatpush3.bf16.msra.mxu0 (!%p877_p2), %v1228_v8  ;;  %1208 = vmatpush3.bf16.msra.mxu1 (!%p877_p2), %v1228_v8  ;;  %v1255_v29 = vld [vmem:[#allocation5 + $0x34] ss:$8 sps:$4 sm:$0xff] (!%p877_p2)   ;;  %v1259_v31 = vld [vmem:[#allocation5 + $0x30] ss:$8 sps:$4 sm:$0xff] (!%p877_p2)  }
  0x37   :  { %77 = vst [vmem:[#allocation2 + $0xf0] sm:$0xff] %v1363_v0  ;;  %78 = vst [vmem:[#allocation2 + $0xf8] sm:$0xff] %v1363_v0  ;;  %1093 = vmatprep.subr.bf16.mxu0 (!%p877_p2), %v1229_v9  ;;  %1201 = vmatprep.subr.bf16.mxu1 (!%p877_p2), %v1229_v9  ;;  %v1257_v30 = vld [vmem:[#allocation5 + $0xb4] ss:$8 sps:$4 sm:$0xff] (!%p877_p2)   ;;  %v1260_v32 = vld [vmem:[#allocation5 + $0xb0] ss:$8 sps:$4 sm:$0xff] (!%p877_p2)  }
  0x38   :  { %v1261_v33 = vld [vmem:[#allocation5 + $0x44] ss:$8 sps:$4 sm:$0xff]   ;;  %v1265_v35 = vld [vmem:[#allocation5 + $0x40] ss:$8 sps:$4 sm:$0xff]   ;;  %v1267_v37 = vld [vmem:[#allocation5 + $0x54] ss:$8 sps:$4 sm:$0xff]  }
  0x39   :  { %v1263_v34 = vld [vmem:[#allocation5 + $0xc4] ss:$8 sps:$4 sm:$0xff]   ;;  %v1266_v36 = vld [vmem:[#allocation5 + $0xc0] ss:$8 sps:$4 sm:$0xff]   ;;  %v1269_v38 = vld [vmem:[#allocation5 + $0xd4] ss:$8 sps:$4 sm:$0xff]  }
  0x3a   :  { %1094 = vmatpush3.bf16.msra.mxu0 %v1230_v10  ;;  %1209 = vmatpush3.bf16.msra.mxu1 %v1230_v10  ;;  %v1271_v39 = vld [vmem:[#allocation5 + $0x50] ss:$8 sps:$4 sm:$0xff]   ;;  %v1273_v41 = vld [vmem:[#allocation5 + $0x64] ss:$8 sps:$4 sm:$0xff]   ;;  %v1277_v43 = vld [vmem:[#allocation5 + $0x60] ss:$8 sps:$4 sm:$0xff]  }
  0x3b   :  { %1095 = vmatprep.subr.bf16.mxu0 %v1231_v11  ;;  %1202 = vmatprep.subr.bf16.mxu1 %v1231_v11  ;;  %v1272_v40 = vld [vmem:[#allocation5 + $0xd0] ss:$8 sps:$4 sm:$0xff]   ;;  %v1275_v42 = vld [vmem:[#allocation5 + $0xe4] ss:$8 sps:$4 sm:$0xff]   ;;  %v1278_v44 = vld [vmem:[#allocation5 + $0xe0] ss:$8 sps:$4 sm:$0xff]  }
  0x3c   :  { %v1279_v45 = vld [vmem:[#allocation5 + $0x74] ss:$8 sps:$4 sm:$0xff]   ;;  %v1283_v47 = vld [vmem:[#allocation5 + $0x70] ss:$8 sps:$4 sm:$0xff]   ;;  %v87_v51 = vld [vmem:[#allocation2] sm:$0xff] }
  0x3d   :  { %v1281_v46 = vld [vmem:[#allocation5 + $0xf4] ss:$8 sps:$4 sm:$0xff]   ;;  %v1284_v48 = vld [vmem:[#allocation5 + $0xf0] ss:$8 sps:$4 sm:$0xff]   ;;  %v103_v53 = vld [vmem:[#allocation2 + $0x80] sm:$0xff] }
  0x3e   :  { %1096 = vmatpush3.bf16.msra.mxu0 %v1232_v14  ;;  %1210 = vmatpush3.bf16.msra.mxu1 %v1232_v14  ;;  %v88_v59 = vld [vmem:[#allocation2 + $0x8] sm:$0xff]  ;;  %v89_v7 = vld [vmem:[#allocation2 + $0x10] sm:$0xff] }
  0x3f   :  { %1097 = vmatprep.subr.bf16.mxu0 %v1233_v15  ;;  %1203 = vmatprep.subr.bf16.mxu1 %v1233_v15  ;;  %v104_v61 = vld [vmem:[#allocation2 + $0x88] sm:$0xff]  ;;  %v105_v9 = vld [vmem:[#allocation2 + $0x90] sm:$0xff]  ;;  %v90_v15 = vld [vmem:[#allocation2 + $0x18] sm:$0xff] }
  0x42   :  { %1098 = vmatpush3.bf16.msra.mxu0 %v1234_v16  ;;  %1211 = vmatpush3.bf16.msra.mxu1 %v1234_v16 }
  0x43   :  { %1099 = vmatprep.subr.bf16.mxu0 %v1235_v17  ;;  %1204 = vmatprep.subr.bf16.mxu1 %v1235_v17  ;;  %v106_v17 = vld [vmem:[#allocation2 + $0x98] sm:$0xff] }
  0x46   :  { %1100 = vmatpush3.bf16.msra.mxu0 %v1236_v18  ;;  %1212 = vmatpush3.bf16.msra.mxu1 %v1236_v18 }
  0x49   :  { %472 = vmatmul.mubr.bf16.vlgmr.msra.gmra.mrb[0].mxu0 %v1237_v19  ;;  %536 = vmatmul.mubr.bf16.vlgmr.msra.gmra.mrb[0].mxu1 %v1240_v20 }
  0x4a   :  { %479 = vmatprep.mubr.bf16.mxu0 %v1243_v21  ;;  %543 = vmatprep.mubr.bf16.mxu1 %v1245_v22 }
  0x51   :  { %480 = vmatmul.mubr.bf16.gmra.mrb[4].mxu0 %v1247_v23  ;;  %544 = vmatmul.mubr.bf16.gmra.mrb[4].mxu1 %v1248_v24 }
  0x52   :  { %487 = vmatprep.mubr.bf16.mxu0 %v1249_v25  ;;  %551 = vmatprep.mubr.bf16.mxu1 %v1251_v26 }
  0x59   :  { %488 = vmatmul.mubr.bf16.gmra.mrb[8].mxu0 %v1253_v27  ;;  %552 = vmatmul.mubr.bf16.gmra.mrb[8].mxu1 %v1254_v28  ;;  %v91_v27 = vld [vmem:[#allocation2 + $0x20] sm:$0xff] }
  0x5a   :  { %495 = vmatprep.mubr.bf16.mxu0 %v1255_v29  ;;  %559 = vmatprep.mubr.bf16.mxu1 %v1257_v30  ;;  %v107_v29 = vld [vmem:[#allocation2 + $0xa0] sm:$0xff] }
  0x61   :  { %496 = vmatmul.mubr.bf16.gmra.mrb[12].mxu0 %v1259_v31  ;;  %560 = vmatmul.mubr.bf16.gmra.mrb[12].mxu1 %v1260_v32 }
  0x62   :  { %503 = vmatprep.mubr.bf16.mxu0 %v1261_v33  ;;  %567 = vmatprep.mubr.bf16.mxu1 %v1263_v34 }
  0x69   :  { %504 = vmatmul.mubr.bf16.gmra.mrb[16].mxu0 %v1265_v35  ;;  %568 = vmatmul.mubr.bf16.gmra.mrb[16].mxu1 %v1266_v36  ;;  %v92_v35 = vld [vmem:[#allocation2 + $0x28] sm:$0xff] }
  0x6a   :  { %511 = vmatprep.mubr.bf16.mxu0 %v1267_v37  ;;  %575 = vmatprep.mubr.bf16.mxu1 %v1269_v38  ;;  %v108_v37 = vld [vmem:[#allocation2 + $0xa8] sm:$0xff] }
  0x71   :  { %512 = vmatmul.mubr.bf16.gmra.mrb[20].mxu0 %v1271_v39  ;;  %576 = vmatmul.mubr.bf16.gmra.mrb[20].mxu1 %v1272_v40 }
  0x72   :  { %519 = vmatprep.mubr.bf16.mxu0 %v1273_v41  ;;  %583 = vmatprep.mubr.bf16.mxu1 %v1275_v42 }
  0x79   :  { %520 = vmatmul.mubr.bf16.gmra.mrb[24].mxu0 %v1277_v43  ;;  %584 = vmatmul.mubr.bf16.gmra.mrb[24].mxu1 %v1278_v44 }
  0x7a   :  { %527 = vmatprep.mubr.bf16.mxu0 %v1279_v45  ;;  %591 = vmatprep.mubr.bf16.mxu1 %v1281_v46 }
  0x81   :  { %528 = vmatmul.mubr.bf16.gmra.mrb[28].mxu0 %v1283_v47  ;;  %592 = vmatmul.mubr.bf16.gmra.mrb[28].mxu1 %v1284_v48  ;;  %v93_v47 = vld [vmem:[#allocation2 + $0x30] sm:$0xff] }
 0x11c   :  { %v1101_v49 = vpop.f32.mrb[0].mxu0  ;;  %v1149_v50 = vpop.f32.mrb[0].mxu1 }
 0x11d   :  { %v1102_v52 = vpop.f32.mrb[1].mxu0  ;;  %v1150_v54 = vpop.f32.mrb[1].mxu1 }
 0x11e   :  { %v1103_v55 = vadd.f32 %v1102_v52, %v1101_v49  ;;  %v1151_v56 = vadd.f32 %v1150_v54, %v1149_v50  ;;  %v1104_v57 = vpop.f32.mrb[2].mxu0  ;;  %v1152_v58 = vpop.f32.mrb[2].mxu1  ;;  %v109_v49 = vld [vmem:[#allocation2 + $0xb0] sm:$0xff] }
 0x11f   :  { %v1105_v60 = vpop.f32.mrb[3].mxu0  ;;  %v1153_v62 = vpop.f32.mrb[3].mxu1 }
 0x120   :  { %v600_v63 = vadd.f32 %v1103_v55, %v87_v51  ;;  %v616_v0 = vadd.f32 %v1151_v56, %v103_v53  ;;  %v1106_v1 = vadd.f32 %v1105_v60, %v1104_v57  ;;  %v1154_v2 = vadd.f32 %v1153_v62, %v1152_v58  ;;  %v94_v55 = vld [vmem:[#allocation2 + $0x38] sm:$0xff] }
 0x121   :  { %v110_v57 = vld [vmem:[#allocation2 + $0xb8] sm:$0xff] }
 0x122   :  { %632 = vst [vmem:[#allocation2] sm:$0xff] %v600_v63  ;;  %648 = vst [vmem:[#allocation2 + $0x80] sm:$0xff] %v616_v0  ;;  %v601_v3 = vadd.f32 %v1106_v1, %v88_v59  ;;  %v617_v4 = vadd.f32 %v1154_v2, %v104_v61 }
 0x124   :  { %633 = vst [vmem:[#allocation2 + $0x8] sm:$0xff] %v601_v3  ;;  %649 = vst [vmem:[#allocation2 + $0x88] sm:$0xff] %v617_v4  ;;  %v1107_v5 = vpop.f32.mrb[4].mxu0  ;;  %v1155_v6 = vpop.f32.mrb[4].mxu1  ;;  %v95_v3 = vld [vmem:[#allocation2 + $0x40] sm:$0xff] }
 0x125   :  { %v1108_v8 = vpop.f32.mrb[5].mxu0  ;;  %v1156_v10 = vpop.f32.mrb[5].mxu1 }
 0x126   :  { %v1109_v11 = vadd.f32 %v1108_v8, %v1107_v5  ;;  %v1157_v12 = vadd.f32 %v1156_v10, %v1155_v6  ;;  %v1110_v13 = vpop.f32.mrb[6].mxu0  ;;  %v1158_v14 = vpop.f32.mrb[6].mxu1  ;;  %v111_v5 = vld [vmem:[#allocation2 + $0xc0] sm:$0xff] }
 0x127   :  { %v1111_v16 = vpop.f32.mrb[7].mxu0  ;;  %v1159_v18 = vpop.f32.mrb[7].mxu1 }
 0x128   :  { %v602_v19 = vadd.f32 %v1109_v11, %v89_v7  ;;  %v618_v20 = vadd.f32 %v1157_v12, %v105_v9  ;;  %v1112_v21 = vadd.f32 %v1111_v16, %v1110_v13  ;;  %v1160_v22 = vadd.f32 %v1159_v18, %v1158_v14  ;;  %v96_v11 = vld [vmem:[#allocation2 + $0x48] sm:$0xff] }
 0x129   :  { %v112_v13 = vld [vmem:[#allocation2 + $0xc8] sm:$0xff] }
 0x12a   :  { %634 = vst [vmem:[#allocation2 + $0x10] sm:$0xff] %v602_v19  ;;  %650 = vst [vmem:[#allocation2 + $0x90] sm:$0xff] %v618_v20  ;;  %v603_v23 = vadd.f32 %v1112_v21, %v90_v15  ;;  %v619_v24 = vadd.f32 %v1160_v22, %v106_v17 }
 0x12c   :  { %635 = vst [vmem:[#allocation2 + $0x18] sm:$0xff] %v603_v23  ;;  %651 = vst [vmem:[#allocation2 + $0x98] sm:$0xff] %v619_v24  ;;  %v1113_v25 = vpop.f32.mrb[8].mxu0  ;;  %v1161_v26 = vpop.f32.mrb[8].mxu1  ;;  %v97_v23 = vld [vmem:[#allocation2 + $0x50] sm:$0xff] }
 0x12d   :  { %v1114_v28 = vpop.f32.mrb[9].mxu0  ;;  %v1162_v30 = vpop.f32.mrb[9].mxu1 }
 0x12e   :  { %v1115_v31 = vadd.f32 %v1114_v28, %v1113_v25  ;;  %v1163_v32 = vadd.f32 %v1162_v30, %v1161_v26  ;;  %v1116_v33 = vpop.f32.mrb[10].mxu0  ;;  %v1164_v34 = vpop.f32.mrb[10].mxu1  ;;  %v113_v25 = vld [vmem:[#allocation2 + $0xd0] sm:$0xff] }
 0x12f   :  { %v1117_v36 = vpop.f32.mrb[11].mxu0  ;;  %v1165_v38 = vpop.f32.mrb[11].mxu1 }
 0x130   :  { %v604_v39 = vadd.f32 %v1115_v31, %v91_v27  ;;  %v620_v40 = vadd.f32 %v1163_v32, %v107_v29  ;;  %v1118_v41 = vadd.f32 %v1117_v36, %v1116_v33  ;;  %v1166_v42 = vadd.f32 %v1165_v38, %v1164_v34  ;;  %v98_v31 = vld [vmem:[#allocation2 + $0x58] sm:$0xff] }
 0x131   :  { %v114_v33 = vld [vmem:[#allocation2 + $0xd8] sm:$0xff] }
 0x132   :  { %636 = vst [vmem:[#allocation2 + $0x20] sm:$0xff] %v604_v39  ;;  %652 = vst [vmem:[#allocation2 + $0xa0] sm:$0xff] %v620_v40  ;;  %v605_v43 = vadd.f32 %v1118_v41, %v92_v35  ;;  %v621_v44 = vadd.f32 %v1166_v42, %v108_v37 }
 0x134   :  { %637 = vst [vmem:[#allocation2 + $0x28] sm:$0xff] %v605_v43  ;;  %653 = vst [vmem:[#allocation2 + $0xa8] sm:$0xff] %v621_v44  ;;  %v1119_v45 = vpop.f32.mrb[12].mxu0  ;;  %v1167_v46 = vpop.f32.mrb[12].mxu1  ;;  %v99_v43 = vld [vmem:[#allocation2 + $0x60] sm:$0xff] }
 0x135   :  { %v1120_v48 = vpop.f32.mrb[13].mxu0  ;;  %v1168_v50 = vpop.f32.mrb[13].mxu1 }
 0x136   :  { %v1121_v51 = vadd.f32 %v1120_v48, %v1119_v45  ;;  %v1169_v52 = vadd.f32 %v1168_v50, %v1167_v46  ;;  %v1122_v53 = vpop.f32.mrb[14].mxu0  ;;  %v1170_v54 = vpop.f32.mrb[14].mxu1  ;;  %v115_v45 = vld [vmem:[#allocation2 + $0xe0] sm:$0xff] }
 0x137   :  { %v1123_v56 = vpop.f32.mrb[15].mxu0  ;;  %v1171_v58 = vpop.f32.mrb[15].mxu1 }
 0x138   :  { %v606_v59 = vadd.f32 %v1121_v51, %v93_v47  ;;  %v622_v60 = vadd.f32 %v1169_v52, %v109_v49  ;;  %v1124_v61 = vadd.f32 %v1123_v56, %v1122_v53  ;;  %v1172_v62 = vadd.f32 %v1171_v58, %v1170_v54  ;;  %v100_v51 = vld [vmem:[#allocation2 + $0x68] sm:$0xff] }
 0x139   :  { %v116_v53 = vld [vmem:[#allocation2 + $0xe8] sm:$0xff] }
 0x13a   :  { %638 = vst [vmem:[#allocation2 + $0x30] sm:$0xff] %v606_v59  ;;  %654 = vst [vmem:[#allocation2 + $0xb0] sm:$0xff] %v622_v60  ;;  %v607_v63 = vadd.f32 %v1124_v61, %v94_v55  ;;  %v623_v0 = vadd.f32 %v1172_v62, %v110_v57 }
 0x13c   :  { %639 = vst [vmem:[#allocation2 + $0x38] sm:$0xff] %v607_v63  ;;  %655 = vst [vmem:[#allocation2 + $0xb8] sm:$0xff] %v623_v0  ;;  %v1125_v1 = vpop.f32.mrb[16].mxu0  ;;  %v1173_v2 = vpop.f32.mrb[16].mxu1  ;;  %v101_v63 = vld [vmem:[#allocation2 + $0x70] sm:$0xff] }
 0x13d   :  { %v1126_v4 = vpop.f32.mrb[17].mxu0  ;;  %v1174_v6 = vpop.f32.mrb[17].mxu1 }
 0x13e   :  { %v1127_v7 = vadd.f32 %v1126_v4, %v1125_v1  ;;  %v1175_v8 = vadd.f32 %v1174_v6, %v1173_v2  ;;  %v1128_v9 = vpop.f32.mrb[18].mxu0  ;;  %v1176_v10 = vpop.f32.mrb[18].mxu1  ;;  %v117_v1 = vld [vmem:[#allocation2 + $0xf0] sm:$0xff] }
 0x13f   :  { %v1129_v12 = vpop.f32.mrb[19].mxu0  ;;  %v1177_v14 = vpop.f32.mrb[19].mxu1 }
 0x140   :  { %v608_v15 = vadd.f32 %v1127_v7, %v95_v3  ;;  %v624_v16 = vadd.f32 %v1175_v8, %v111_v5  ;;  %v1130_v17 = vadd.f32 %v1129_v12, %v1128_v9  ;;  %v1178_v18 = vadd.f32 %v1177_v14, %v1176_v10  ;;  %v102_v7 = vld [vmem:[#allocation2 + $0x78] sm:$0xff] }
 0x141   :  { %v118_v9 = vld [vmem:[#allocation2 + $0xf8] sm:$0xff] }
 0x142   :  { %640 = vst [vmem:[#allocation2 + $0x40] sm:$0xff] %v608_v15  ;;  %656 = vst [vmem:[#allocation2 + $0xc0] sm:$0xff] %v624_v16  ;;  %v609_v19 = vadd.f32 %v1130_v17, %v96_v11  ;;  %v625_v20 = vadd.f32 %v1178_v18, %v112_v13 }
 0x144   :  { %641 = vst [vmem:[#allocation2 + $0x48] sm:$0xff] %v609_v19  ;;  %657 = vst [vmem:[#allocation2 + $0xc8] sm:$0xff] %v625_v20  ;;  %v1131_v21 = vpop.f32.mrb[20].mxu0  ;;  %v1179_v22 = vpop.f32.mrb[20].mxu1 }
 0x145   :  { %v1132_v24 = vpop.f32.mrb[21].mxu0  ;;  %v1180_v26 = vpop.f32.mrb[21].mxu1 }
 0x146   :  { %v1133_v27 = vadd.f32 %v1132_v24, %v1131_v21  ;;  %v1181_v28 = vadd.f32 %v1180_v26, %v1179_v22  ;;  %v1134_v29 = vpop.f32.mrb[22].mxu0  ;;  %v1182_v30 = vpop.f32.mrb[22].mxu1 }
 0x147   :  { %v1135_v32 = vpop.f32.mrb[23].mxu0  ;;  %v1183_v34 = vpop.f32.mrb[23].mxu1 }
 0x148   :  { %v610_v35 = vadd.f32 %v1133_v27, %v97_v23  ;;  %v626_v36 = vadd.f32 %v1181_v28, %v113_v25  ;;  %v1136_v37 = vadd.f32 %v1135_v32, %v1134_v29  ;;  %v1184_v38 = vadd.f32 %v1183_v34, %v1182_v30 }
 0x14a   :  { %642 = vst [vmem:[#allocation2 + $0x50] sm:$0xff] %v610_v35  ;;  %658 = vst [vmem:[#allocation2 + $0xd0] sm:$0xff] %v626_v36  ;;  %v611_v39 = vadd.f32 %v1136_v37, %v98_v31  ;;  %v627_v40 = vadd.f32 %v1184_v38, %v114_v33 }
 0x14c   :  { %643 = vst [vmem:[#allocation2 + $0x58] sm:$0xff] %v611_v39  ;;  %659 = vst [vmem:[#allocation2 + $0xd8] sm:$0xff] %v627_v40  ;;  %v1137_v41 = vpop.f32.mrb[24].mxu0  ;;  %v1185_v42 = vpop.f32.mrb[24].mxu1 }
 0x14d   :  { %v1138_v44 = vpop.f32.mrb[25].mxu0  ;;  %v1186_v46 = vpop.f32.mrb[25].mxu1 }
 0x14e   :  { %v1139_v47 = vadd.f32 %v1138_v44, %v1137_v41  ;;  %v1187_v48 = vadd.f32 %v1186_v46, %v1185_v42  ;;  %v1140_v49 = vpop.f32.mrb[26].mxu0  ;;  %v1188_v50 = vpop.f32.mrb[26].mxu1 }
 0x14f   :  { %v1141_v52 = vpop.f32.mrb[27].mxu0  ;;  %v1189_v54 = vpop.f32.mrb[27].mxu1 }
 0x150   :  { %v612_v55 = vadd.f32 %v1139_v47, %v99_v43  ;;  %v628_v56 = vadd.f32 %v1187_v48, %v115_v45  ;;  %v1142_v57 = vadd.f32 %v1141_v52, %v1140_v49  ;;  %v1190_v58 = vadd.f32 %v1189_v54, %v1188_v50 }
 0x152   :  { %644 = vst [vmem:[#allocation2 + $0x60] sm:$0xff] %v612_v55  ;;  %660 = vst [vmem:[#allocation2 + $0xe0] sm:$0xff] %v628_v56  ;;  %v613_v59 = vadd.f32 %v1142_v57, %v100_v51  ;;  %v629_v60 = vadd.f32 %v1190_v58, %v116_v53 }
 0x154   :  { %645 = vst [vmem:[#allocation2 + $0x68] sm:$0xff] %v613_v59  ;;  %661 = vst [vmem:[#allocation2 + $0xe8] sm:$0xff] %v629_v60  ;;  %v1143_v61 = vpop.f32.mrb[28].mxu0  ;;  %v1191_v62 = vpop.f32.mrb[28].mxu1 }
 0x155   :  { %v1144_v0 = vpop.f32.mrb[29].mxu0  ;;  %v1192_v2 = vpop.f32.mrb[29].mxu1 }
 0x156   :  { %v1145_v3 = vadd.f32 %v1144_v0, %v1143_v61  ;;  %v1193_v4 = vadd.f32 %v1192_v2, %v1191_v62  ;;  %v1146_v5 = vpop.f32.mrb[30].mxu0  ;;  %v1194_v6 = vpop.f32.mrb[30].mxu1 }
 0x157   :  { %v1147_v8 = vpop.f32.mrb[31].mxu0  ;;  %v1195_v10 = vpop.f32.mrb[31].mxu1 }
 0x158   :  { %v614_v11 = vadd.f32 %v1145_v3, %v101_v63  ;;  %v630_v12 = vadd.f32 %v1193_v4, %v117_v1  ;;  %v1148_v13 = vadd.f32 %v1147_v8, %v1146_v5  ;;  %v1196_v14 = vadd.f32 %v1195_v10, %v1194_v6 }
 0x15a   :  { %646 = vst [vmem:[#allocation2 + $0x70] sm:$0xff] %v614_v11  ;;  %662 = vst [vmem:[#allocation2 + $0xf0] sm:$0xff] %v630_v12  ;;  %v615_v15 = vadd.f32 %v1148_v13, %v102_v7  ;;  %v631_v16 = vadd.f32 %v1196_v14, %v118_v9 }
 0x15c   :  { %647 = vst [vmem:[#allocation2 + $0x78] sm:$0xff] %v615_v15  ;;  %663 = vst [vmem:[#allocation2 + $0xf8] sm:$0xff] %v631_v16 }
 0x15d PF:  { %v667_v17 = vld [vmem:[#allocation2] sm:$0xff]  ;;  %v668_v18 = vld [vmem:[#allocation2 + $0x8] sm:$0xff]  ;;  %v669_v19 = vld [vmem:[#allocation2 + $0x10] sm:$0xff]  ;;  %s1364_s0 = smov [#allocation10]  }
 0x15e   :  { %v993_v20 = vpack.c.bf16 %v668_v18, %v667_v17  ;;  %v670_v21 = vld [vmem:[#allocation2 + $0x18] sm:$0xff]  ;;  %v671_v22 = vld [vmem:[#allocation2 + $0x20] sm:$0xff]  ;;  %v672_v23 = vld [vmem:[#allocation2 + $0x28] sm:$0xff]  ;;  %s864_s13 = sshll.u32 %s1364_s0, 4  ;;  %s865_s13 = int_to_ptr.vmem [resolvable:$true] %s864_s13 }
 0x15f   :  { %v998_v24 = vpack.c.bf16 %v670_v21, %v669_v19  ;;  %v1003_v25 = vpack.c.bf16 %v672_v23, %v671_v22  ;;  %v673_v26 = vld [vmem:[#allocation2 + $0x30] sm:$0xff]  ;;  %v674_v27 = vld [vmem:[#allocation2 + $0x38] sm:$0xff]  ;;  %v675_v28 = vld [vmem:[#allocation2 + $0x40] sm:$0xff]  ;;  %s1329_s14 = scalar_lea.vmem %s865_s13, 2048  ;;  %p1334_p4 = scmp.lt.s32.totalorder %s865_s13, %s865_s13 }
 0x160   :  { %994 = vst [vmem:[#allocation10] sm:$0xff] %v993_v20   ;;  %v1008_v29 = vpack.c.bf16 %v674_v27, %v673_v26  ;;  %v676_v30 = vld [vmem:[#allocation2 + $0x48] sm:$0xff]  ;;  %v677_v31 = vld [vmem:[#allocation2 + $0x50] sm:$0xff]  ;;  %v678_v32 = vld [vmem:[#allocation2 + $0x58] sm:$0xff]  ;;  %p1330_p3 = scmp.ne.s32.totalorder %s865_s13, %s1329_s14  ;;  %p1335_p5 = scmp.lt.s32.totalorder %s1329_s14, %s1329_s14 }
 0x161   :  { %1070 = vst [vmem:[#allocation10 + $0x8] sm:$0xff] %v998_v24   ;;  %1071 = vst [vmem:[#allocation10 + $0x10] sm:$0xff] %v1003_v25   ;;  %v1013_v33 = vpack.c.bf16 %v676_v30, %v675_v28  ;;  %v1018_v34 = vpack.c.bf16 %v678_v32, %v677_v31  ;;  %v679_v35 = vld [vmem:[#allocation2 + $0x60] sm:$0xff]  ;;  %v680_v36 = vld [vmem:[#allocation2 + $0x68] sm:$0xff] }
 0x162   :  { %v681_v37 = vld [vmem:[#allocation2 + $0x70] sm:$0xff]  ;;  %1072 = vst [vmem:[#allocation10 + $0x18] sm:$0xff] %v1008_v29   ;;  %v1023_v38 = vpack.c.bf16 %v680_v36, %v679_v35  ;;  %v683_v40 = vld [vmem:[#allocation2 + $0x80] sm:$0xff]  ;;  %v684_v41 = vld [vmem:[#allocation2 + $0x88] sm:$0xff]  ;;  %p1336_p6 = por %p1335_p5, %p1334_p4 }
 0x163   :  { %v682_v39 = vld [vmem:[#allocation2 + $0x78] sm:$0xff]  ;;  %1073 = vst [vmem:[#allocation10 + $0x20] sm:$0xff] %v1013_v33   ;;  %1074 = vst [vmem:[#allocation10 + $0x28] sm:$0xff] %v1018_v34   ;;  %v1033_v43 = vpack.c.bf16 %v684_v41, %v683_v40  ;;  %v685_v44 = vld [vmem:[#allocation2 + $0x90] sm:$0xff] }
 0x164   :  { %v1028_v42 = vpack.c.bf16 %v682_v39, %v681_v37  ;;  %v686_v45 = vld [vmem:[#allocation2 + $0x98] sm:$0xff]  ;;  %v687_v46 = vld [vmem:[#allocation2 + $0xa0] sm:$0xff]  ;;  %1075 = vst [vmem:[#allocation10 + $0x30] sm:$0xff] %v1023_v38   ;;  %v688_v48 = vld [vmem:[#allocation2 + $0xa8] sm:$0xff]  ;;  %p1337_p7 = pnand %p1336_p6, %p1330_p3 }
 0x165   :  { %v1038_v47 = vpack.c.bf16 %v686_v45, %v685_v44  ;;  %v689_v49 = vld [vmem:[#allocation2 + $0xb0] sm:$0xff]  ;;  %v690_v50 = vld [vmem:[#allocation2 + $0xb8] sm:$0xff]  ;;  %1077 = vst [vmem:[#allocation10 + $0x40] sm:$0xff] %v1033_v43   ;;  %v1043_v51 = vpack.c.bf16 %v688_v48, %v687_v46  ;;  %v691_v53 = vld [vmem:[#allocation2 + $0xc0] sm:$0xff] }
 0x166   :  { %1076 = vst [vmem:[#allocation10 + $0x38] sm:$0xff] %v1028_v42   ;;  %v1048_v52 = vpack.c.bf16 %v690_v50, %v689_v49  ;;  %v692_v54 = vld [vmem:[#allocation2 + $0xc8] sm:$0xff]  ;;  %v693_v55 = vld [vmem:[#allocation2 + $0xd0] sm:$0xff]  ;;  %v694_v57 = vld [vmem:[#allocation2 + $0xd8] sm:$0xff] }
 0x167   :  { %1078 = vst [vmem:[#allocation10 + $0x48] sm:$0xff] %v1038_v47   ;;  %v1053_v56 = vpack.c.bf16 %v692_v54, %v691_v53  ;;  %v695_v58 = vld [vmem:[#allocation2 + $0xe0] sm:$0xff]  ;;  %v696_v59 = vld [vmem:[#allocation2 + $0xe8] sm:$0xff]  ;;  %1079 = vst [vmem:[#allocation10 + $0x50] sm:$0xff] %v1043_v51   ;;  %v1058_v60 = vpack.c.bf16 %v694_v57, %v693_v55 }
 0x168   :  { %1080 = vst [vmem:[#allocation10 + $0x58] sm:$0xff] %v1048_v52   ;;  %v1063_v61 = vpack.c.bf16 %v696_v59, %v695_v58  ;;  %v697_v62 = vld [vmem:[#allocation2 + $0xf0] sm:$0xff]  ;;  %v698_v63 = vld [vmem:[#allocation2 + $0xf8] sm:$0xff] }
 0x169   :  { %1081 = vst [vmem:[#allocation10 + $0x60] sm:$0xff] %v1053_v56   ;;  %v1068_v0 = vpack.c.bf16 %v698_v63, %v697_v62  ;;  %1082 = vst [vmem:[#allocation10 + $0x68] sm:$0xff] %v1058_v60  }
 0x16a   :  { %1083 = vst [vmem:[#allocation10 + $0x70] sm:$0xff] %v1063_v61  }
 0x16b   :  { %1084 = vst [vmem:[#allocation10 + $0x78] sm:$0xff] %v1068_v0  }
 0x16c   :  { %1340 = shalt.err (!%p1337_p7)
}
 0x16d   :  { %s1341_s17 = scalar_lea.hbm %s1433_s3, 2048 }
 0x16e   :  { %p1342_p8 = scmp.ne.s32.totalorder %s1433_s3, %s1341_s17  ;;  %p1345_p9 = scmp.lt.u32.totalorder %s1341_s17, %s1433_s3 }
 0x170   :  { %p1347_p10 = pnand %p1345_p9, %p1342_p8 }
 0x172   :  { %1350 = shalt.err (!%p1347_p10)
}
 0x173   :  { %870 = dma.vmem_to_hbm [thread:$0]  %s865_s13, 2048, %s1433_s3, [#allocation7], %s1361_s1, %s1361_s1, %s1362_s9  }
 0x174   :  { %1355 = dma.done.wait [#allocation7], 2048  }
 0x175   :  { %1356 = vsyncadd [#allocation7], 4294965248 }
 0x176   :  { %874 = vsyncpa [#allocation6], 1 }
 0x177   :  { %875 = vsyncpa [#allocation9], 1 }
 0x178   :  { %876 = vsyncpa [#allocation7], 1 }

</bundles_post_ra>
